<compile_context>
chip_gen: v7x
topology: tpu7x:2x2x1
jax: 0.10.0
libtpu: 0.0.40
codegen_flags: <defaults>
</compile_context>

<pallas_src>
import functools

import numpy as np
import jax
import jax.numpy as jnp
from jax.experimental import pallas as pl
from jax.experimental.pallas import tpu as pltpu


def _round_up(a, b):
    return ((a + b - 1) // b) * b


# ----------------------------------------------------------------------------
# Hardware introspection for generation-aware tiling.
# ----------------------------------------------------------------------------
def _tpu_generation():
    try:
        kind = jax.devices()[0].device_kind.lower()
    except Exception:
        return "unknown"
    if "v5 lite" in kind or "v5e" in kind or "v5lite" in kind:
        return "v5e"
    if "v6" in kind:
        return "v6e"
    if "v7" in kind or "7x" in kind:
        return "v7x"
    if "v5" in kind:  # v5p
        return "v5p"
    return "unknown"


def _vmem_capacity_bytes(gen):
    try:
        cap = getattr(pltpu.get_tpu_info(), "vmem_capacity_bytes", None)
        if cap:
            return int(cap)
    except Exception:
        pass
    return {"v5e": 128 << 20, "v6e": 128 << 20, "v5p": 128 << 20,
            "v7x": 64 << 20}.get(gen, 64 << 20)


def _tn_target(gen, itemsize):
    # Sized so the x re-stream arithmetic intensity (~2*tn/itemsize flop/B)
    # clears each generation's HBM roofline ridge without blowing its VMEM.
    if gen == "v5e":
        return 256                                 # ridge ~240 flop/B
    if gen == "v6e":
        return 1024 if itemsize <= 2 else 512      # ridge ~714 flop/B (bf16)
    if gen == "v7x":
        return 512                                 # ridge ~310 flop/B, 64 MiB VMEM
    return 512


# ----------------------------------------------------------------------------
# Kernels.
# ----------------------------------------------------------------------------
def _fullk_kernel(x_ref, w_ref, b_ref, o_ref, *, beta):
    # x_ref: (tm, nx), w_ref: (nx, tn), b_ref: (1, tn), o_ref: (tm, tn)
    acc = jnp.dot(x_ref[...], w_ref[...], preferred_element_type=jnp.float32)
    if beta == 1.0:
        acc = acc + b_ref[...].astype(jnp.float32)
    elif beta != 0.0:
        acc = acc + beta * b_ref[...].astype(jnp.float32)
    o_ref[...] = acc.astype(o_ref.dtype)


def _ktiled_kernel(x_ref, w_ref, b_ref, o_ref, acc_ref, *, beta, nx, tk):
    # grid = (nf tiles, M tiles, K tiles); K innermost ("arbitrary").
    k = pl.program_id(2)
    nk = pl.num_programs(2)

    @pl.when(k == 0)
    def _():
        acc_ref[...] = jnp.zeros_like(acc_ref)

    x_blk = x_ref[...]
    w_blk = w_ref[...]
    if nx % tk != 0:
        # Last K block reaches past nx: the OOB region is unspecified (possibly
        # NaN), so zero it on BOTH operands before feeding the MXU.
        lim = nx - k * tk
        col = jax.lax.broadcasted_iota(jnp.int32, x_blk.shape, 1)
        x_blk = jnp.where(col < lim, x_blk, jnp.zeros_like(x_blk))
        row = jax.lax.broadcasted_iota(jnp.int32, w_blk.shape, 0)
        w_blk = jnp.where(row < lim, w_blk, jnp.zeros_like(w_blk))

    acc_ref[...] += jnp.dot(x_blk, w_blk, preferred_element_type=jnp.float32)

    @pl.when(k == nk - 1)
    def _():
        res = acc_ref[...]
        if beta == 1.0:
            res = res + b_ref[...].astype(jnp.float32)
        elif beta != 0.0:
            res = res + beta * b_ref[...].astype(jnp.float32)
        o_ref[...] = res.astype(o_ref.dtype)


# ----------------------------------------------------------------------------
# Wrapper.
# ----------------------------------------------------------------------------
def conv1d(x, weight, bias=None, beta=1, *, block_m=None, block_n=None,
           block_k=None):
    """Pallas implementation of GPT Conv1D forward: beta * bias + x @ W."""
    *lead, nx = x.shape
    nx_w, nf = weight.shape
    assert nx == nx_w, f"feature mismatch: x has {nx}, weight has {nx_w}"
    M = int(np.prod(lead)) if lead else 1
    beta = float(beta)

    if bias is None:
        bias = jnp.zeros((nf,), dtype=x.dtype)
    # addmm assumes a single compute dtype; result is cast back to x.dtype.
    if weight.dtype != x.dtype:
        weight = weight.astype(x.dtype)
    if bias.dtype != x.dtype:
        bias = bias.astype(x.dtype)

    x2 = x.reshape(M, nx)
    flops = 2 * M * nx * nf
    forced = any(b is not None for b in (block_m, block_n, block_k))

    # Small problems: per-grid-step overhead and sub-(8,128) tiles mean the
    # kernel cannot beat the fused XLA matmul; just use XLA.
    if not forced and (M < 8 or nf < 128 or flops < (4 << 20)):
        y = jnp.dot(x2, weight, preferred_element_type=jnp.float32)
        if beta != 0.0:
            y = y + beta * bias.astype(jnp.float32)
        return y.astype(x.dtype).reshape(*lead, nf)

    in_is = x.dtype.itemsize
    out_is = in_is
    sub = {1: 32, 2: 16, 4: 8}.get(in_is, 8)       # dtype-native sublane tile

    gen = _tpu_generation()
    vmem_phys = _vmem_capacity_bytes(gen)
    vmem_limit = max(32 << 20, min(vmem_phys - (16 << 20), 100 << 20))
    budget = vmem_limit // 2                        # headroom for Mosaic internals

    if block_m is not None:
        tm = _round_up(min(int(block_m), _round_up(M, sub)), sub)
    else:
        tm = min(512 if in_is <= 2 else 256, _round_up(M, sub))
    if block_n is not None:
        tn = _round_up(min(int(block_n), _round_up(nf, 128)), 128)
    else:
        tn = min(_tn_target(gen, in_is), _round_up(nf, 128))

    bias2 = bias.reshape(1, nf)
    n_t = pl.cdiv(nf, tn)
    m_t = pl.cdiv(M, tm)

    # Full-K path: the weight column block stays VMEM-resident across the whole
    # inner M sweep (W streamed from HBM exactly once); x re-streamed n_t times.
    fullk_bytes = 2 * (tm * nx + nx * tn) * in_is + 2 * tm * tn * out_is
    use_ktiled = (block_k is not None) or (fullk_bytes > budget)

    if not use_ktiled:
        grid = (n_t, m_t)
        dims = ("parallel", "arbitrary") if n_t >= 2 else ("parallel", "parallel")
        cost = pl.CostEstimate(
            flops=int(flops), transcendentals=0,
            bytes_accessed=int(in_is * M * nx * n_t + in_is * nx * nf
                               + in_is * nf + out_is * M * nf))
        out = pl.pallas_call(
            functools.partial(_fullk_kernel, beta=beta),
            out_shape=jax.ShapeDtypeStruct((M, nf), x.dtype),
            grid_spec=pltpu.PrefetchScalarGridSpec(
                num_scalar_prefetch=0,
                grid=grid,
                in_specs=[
                    pl.BlockSpec((tm, nx), lambda j, i: (i, 0)),   # x row tile (full K)
                    pl.BlockSpec((nx, tn), lambda j, i: (0, j)),   # resident W column tile
                    pl.BlockSpec((1, tn), lambda j, i: (0, j)),    # bias tile
                ],
                out_specs=pl.BlockSpec((tm, tn), lambda j, i: (i, j)),
            ),
            compiler_params=pltpu.CompilerParams(
                dimension_semantics=dims, vmem_limit_bytes=int(vmem_limit)),
            cost_estimate=cost,
        )(x2, weight, bias2)
        return out.reshape(*lead, nf)

    # K-tiled accumulator path: decouples the VMEM footprint from nx.
    if block_k is not None:
        tk = max(128, (int(block_k) // 128) * 128)
    else:
        fixed = 2 * tm * tn * out_is + tm * tn * 4
        per_k = 2 * (tm + tn) * in_is
        tk = max(128, ((budget - fixed) // per_k) // 128 * 128)
    tk = min(tk, 2048, _round_up(nx, 128))
    k_t = pl.cdiv(nx, tk)

    grid = (n_t, m_t, k_t)
    dims = (("parallel", "arbitrary", "arbitrary") if n_t >= 2
            else ("parallel", "parallel", "arbitrary"))
    cost = pl.CostEstimate(
        flops=int(flops), transcendentals=0,
        bytes_accessed=int(in_is * M * nx * n_t + in_is * nx * nf * m_t
                           + in_is * nf + out_is * M * nf))
    out = pl.pallas_call(
        functools.partial(_ktiled_kernel, beta=beta, nx=nx, tk=tk),
        out_shape=jax.ShapeDtypeStruct((M, nf), x.dtype),
        grid_spec=pltpu.PrefetchScalarGridSpec(
            num_scalar_prefetch=0,
            grid=grid,
            in_specs=[
                pl.BlockSpec((tm, tk), lambda j, i, k: (i, k)),    # x tile
                pl.BlockSpec((tk, tn), lambda j, i, k: (k, j)),    # W tile
                pl.BlockSpec((1, tn), lambda j, i, k: (0, j)),     # bias tile
            ],
            out_specs=pl.BlockSpec((tm, tn), lambda j, i, k: (i, j)),
            scratch_shapes=[pltpu.VMEM((tm, tn), jnp.float32)],
        ),
        compiler_params=pltpu.CompilerParams(
            dimension_semantics=dims, vmem_limit_bytes=int(vmem_limit)),
        cost_estimate=cost,
    )(x2, weight, bias2)
    return out.reshape(*lead, nf)


if __name__ == "__main__":
    key = jax.random.PRNGKey(0)

    def ref_conv1d(x, w, b, beta=1):
        y = x.reshape(-1, x.shape[-1]).astype(jnp.float32) @ w.astype(jnp.float32)
        if beta:
            y = y + float(beta) * b.astype(jnp.float32)
        return y.reshape(*x.shape[:-1], w.shape[-1])

    # --- Test 1: aligned shapes, full-K weight-resident path ---
    nx, nf, batch, seq = 128, 384, 4, 128
    k1, k2, key = jax.random.split(key, 3)
    w1 = 0.02 * jax.random.normal(k1, (nx, nf), jnp.float32)
    b1 = 0.01 * jnp.arange(nf, dtype=jnp.float32)
    x1 = jax.random.normal(k2, (batch, seq, nx), jnp.float32)
    y1 = jax.block_until_ready(conv1d(x1, w1, b1, beta=1))
    np.testing.assert_allclose(np.asarray(y1), np.asarray(ref_conv1d(x1, w1, b1)),
                               rtol=5e-4, atol=5e-4)

    # --- Test 2: ragged M and nf (OOB edge blocks, no jnp.pad) ---
    nx, nf, batch, seq = 160, 392, 2, 67
    k1, k2, k3, key = jax.random.split(key, 4)
    w2 = 0.02 * jax.random.normal(k1, (nx, nf), jnp.float32)
    b2 = 0.05 * jax.random.normal(k2, (nf,), jnp.float32)
    x2_in = jax.random.normal(k3, (batch, seq, nx), jnp.float32)
    y2 = jax.block_until_ready(conv1d(x2_in, w2, b2, beta=1))
    np.testing.assert_allclose(np.asarray(y2), np.asarray(ref_conv1d(x2_in, w2, b2)),
                               rtol=5e-4, atol=5e-4)

    # --- Test 3: forced K-tiled accumulator path with a K remainder ---
    nx, nf, batch, seq = 400, 256, 2, 80
    k1, k2, k3, key = jax.random.split(key, 4)
    w3 = 0.02 * jax.random.normal(k1, (nx, nf), jnp.float32)
    b3 = 0.05 * jax.random.normal(k2, (nf,), jnp.float32)
    x3 = jax.random.normal(k3, (batch, seq, nx), jnp.float32)
    y3 = jax.block_until_ready(conv1d(x3, w3, b3, beta=1, block_k=128))
    np.testing.assert_allclose(np.asarray(y3), np.asarray(ref_conv1d(x3, w3, b3)),
                               rtol=5e-4, atol=5e-4)

    # --- Test 4: bf16 inputs (16-row sublane tm, bf16 MXU path), beta=0 ---
    nx, nf, batch, seq = 256, 512, 2, 128
    k1, k2, key = jax.random.split(key, 3)
    w4 = (0.02 * jax.random.normal(k1, (nx, nf), jnp.float32)).astype(jnp.bfloat16)
    b4 = jnp.zeros((nf,), jnp.bfloat16)
    x4 = jax.random.normal(k2, (batch, seq, nx), jnp.float32).astype(jnp.bfloat16)
    y4 = jax.block_until_ready(conv1d(x4, w4, b4, beta=0))
    np.testing.assert_allclose(np.asarray(y4.astype(jnp.float32)),
                               np.asarray(ref_conv1d(x4, w4, b4, beta=0)),
                               rtol=2e-2, atol=2e-2)

    print("KERNEL_OK")
</pallas_src>

<mosaic_0001>
module attributes {stable_mosaic.version = 11 : i64} {
  func.func @_fullk_kernel(%arg0: i32, %arg1: i32, %arg2: memref<256x128xf32, #tpu.memory_space<vmem>>, %arg3: memref<128x384xf32, #tpu.memory_space<vmem>>, %arg4: memref<1x384xf32, #tpu.memory_space<vmem>>, %arg5: memref<256x384xf32, #tpu.memory_space<vmem>>) attributes {dimension_semantics = [#tpu.dimension_semantics<parallel>, #tpu.dimension_semantics<parallel>], iteration_bounds = array<i64: 1, 2>, scalar_prefetch = 0 : i64, scratch_operands = 0 : i64, tpu.core_type = #tpu.core_type<tc>, window_params = [{transform_indices = @transform_0, window_bounds = array<i64: 256, 128>}, {transform_indices = @transform_1, window_bounds = array<i64: 128, 384>}, {transform_indices = @transform_2, window_bounds = array<i64: 1, 384>}, {transform_indices = @transform_3, window_bounds = array<i64: 256, 384>}]} {
    %c0 = arith.constant 0 : index
    %c0_0 = arith.constant 0 : index
    %0 = vector.load %arg2[%c0, %c0_0] : memref<256x128xf32, #tpu.memory_space<vmem>>, vector<256x128xf32>
    %c0_1 = arith.constant 0 : index
    %c0_2 = arith.constant 0 : index
    %1 = vector.load %arg3[%c0_1, %c0_2] : memref<128x384xf32, #tpu.memory_space<vmem>>, vector<128x384xf32>
    %cst = arith.constant dense<0.000000e+00> : vector<256x384xf32>
    %2 = tpu.matmul %0, %1, %cst {dimension_numbers = #tpu.dot_dimension_numbers<[1], [0], [0], [1], [0, 0, 1, 1], [], []>} : vector<256x128xf32>, vector<128x384xf32>, vector<256x384xf32> -> vector<256x384xf32>
    %c0_3 = arith.constant 0 : index
    %c0_4 = arith.constant 0 : index
    %3 = vector.load %arg4[%c0_3, %c0_4] : memref<1x384xf32, #tpu.memory_space<vmem>>, vector<1x384xf32>
    %4 = vector.broadcast %3 : vector<1x384xf32> to vector<256x384xf32>
    %5 = arith.addf %2, %4 : vector<256x384xf32>
    %c0_5 = arith.constant 0 : index
    %c0_6 = arith.constant 0 : index
    %6 = vector.load %arg5[%c0_5, %c0_6] : memref<256x384xf32, #tpu.memory_space<vmem>>, vector<256x384xf32>
    tpu.vector_store %arg5[%c0_5, %c0_6], %5 {strides = array<i32>} : memref<256x384xf32, #tpu.memory_space<vmem>>, vector<256x384xf32>,
    return
  }
  func.func @transform_0(%arg0: i32, %arg1: i32) -> (i32, i32) {
    %c0_i32 = arith.constant 0 : i32
    %c0_i32_0 = arith.constant 0 : i32
    return %arg1, %c0_i32 : i32, i32
  }
  func.func @transform_1(%arg0: i32, %arg1: i32) -> (i32, i32) {
    %c0_i32 = arith.constant 0 : i32
    %c0_i32_0 = arith.constant 0 : i32
    return %c0_i32, %arg0 : i32, i32
  }
  func.func @transform_2(%arg0: i32, %arg1: i32) -> (i32, i32) {
    %c0_i32 = arith.constant 0 : i32
    %c0_i32_0 = arith.constant 0 : i32
    return %c0_i32, %arg0 : i32, i32
  }
  func.func @transform_3(%arg0: i32, %arg1: i32) -> (i32, i32) {
    %c0_i32 = arith.constant 0 : i32
    return %arg1, %arg0 : i32, i32
  }
}

</mosaic_0001>

<bundles_post_ra>
// kernel: tpu_custom_call.1
= control target key start
LH: loop header
LB: loop body
LE: loop exit
PB: predicated region body
PF: predicated region fallthrough
CT: control target
= control target key end

     0   :  { %8 = vsyncpa [#allocation3], 0  ;;  %s2077_s0 = inlined_call_operand.hbm [shape: f32[512,128], index: 0, kind: input, shape index: {}]   ;;  %s2078_s1 = inlined_call_operand.hbm [shape: f32[128,384], index: 1, kind: input, shape index: {}]   ;;  %s2079_s2 = inlined_call_operand.vmem [shape: f32[1,384], index: 2, kind: input, shape index: {}]   ;;  %s2080_s3 = inlined_call_operand.hbm [shape: f32[512,384], index: 3, kind: output, shape index: {}]  }
   0x1   :  { %10 = vsyncpa [#allocation3 + $0x1], 0 }
   0x2   :  { %11 = vsyncpa [#allocation6], 0 }
   0x3   :  { %12 = vsyncpa [#allocation4], 0 }
   0x4   :  { %14 = vsyncpa [#allocation4 + $0x1], 0  ;;  %s1533_s12 = smov 0   ;;  %s1535_s13 = smov 0  }
   0x5   :  { %s1537_s14 = smov 0   ;;  %s1539_s15 = smov 0  }
   0x6   :  { %s1541_s16 = smov 0   ;;  %s1543_s17 = smov 0  }
   0x7 LB: > { %s1049_s18 = sadd.s32 4294967295, %s1501_s17   ;;  %s1050_s19 = sadd.s32 4294967294, %s1501_s17   ;;  %s1501_s17 = sphi %s1543_s17, %s20_s17   ;;  %s1497_s16 = sphi %s1541_s16, %s2104_s16   ;;  %s1493_s15 = sphi %s1539_s15, %s2103_s15   ;;  %s1489_s14 = sphi %s1537_s14, %s2102_s14   ;;  %s1485_s13 = sphi %s1535_s13, %s2101_s13   ;;  %s1481_s12 = sphi %s1533_s12, %s2100_s12  }
   0x8   : > { %p52_p0 = scmp.ne.s32.totalorder %s1485_s13, %s1481_s12  ;;  %p1567_p1 = scmp.eq.s32.totalorder %s1049_s18, 0 }
   0x9   : > { %p1571_p2 = scmp.eq.s32.totalorder %s1049_s18, 1  ;;  %p136_p3 = scmp.eq.s32.totalorder %s1050_s19, 1 }
   0xa   : > { %s2085_s20 = scalar_select %p1567_p1, 1, 0 }
   0xb   : > { %s2086_s21 = scalar_select %p1571_p2, 1, 0 }
   0xc   : > { %p1577_p4 = por %p1567_p1, %p52_p0  ;;  %p1051_p5 = scmp.ge.s32.totalorder %s1501_s17, 1 }
   0xd   : > { %p1582_p6 = por %p136_p3, %p52_p0  ;;  %p143_p7 = scmp.lt.s32.totalorder %s1501_s17, 3 }
   0xe   : > { %s2087_s22 = scalar_select %p1577_p4, 1, 0 }
   0xf   : > { %s2088_s23 = scalar_select %p1582_p6, 1, 0 }
  0x10   : > { %p1587_p8 = pnand %p1051_p5, %p143_p7  ;;  %s1503_s25 = smov [#allocation5]  }
  0x11   : > { %s158_s26 = sshll.u32 %s1503_s25, 4  ;;  %s29_s28 = sadd.s32 1, %s1497_s16  ;;  %s159_s26 = int_to_ptr.vmem [resolvable:$true] %s158_s26 }
  0x12   : > { %s2089_s24 = scalar_select %p1587_p8, 1, 0 }
  0x13   : > { %p1285_p9 = pneg %p1587_p8  ;;  %s1357_s4 = scalar_lea.hbm %s2078_s1, 6144 }
  0x14   : > { %p1358_p12 = scmp.ne.s32.totalorder %s2078_s1, %s1357_s4  ;;  %p1364_p5 = scmp.lt.u32.totalorder %s1357_s4, %s2078_s1 }
  0x15   : > { %p1596_p11 = pnand %p1285_p9, %p1567_p1 }
  0x17   : > { %p1359_p13 = pneg %p1596_p11 }
  0x19   : > { %p1360_p0 = pnand %p1359_p13, %p1358_p12 }
  0x1b   : > { %p1361_p3 = pneg %p1360_p0 }
  0x1d   : > { %p1366_p7 = pnand %p1364_p5, %p1361_p3 }
  0x1f   : > { %1369 = shalt.err (!%p1366_p7)
}
  0x20   : > { %s1370_s9 = scalar_lea.vmem %s159_s26, 6144  ;;  %p1378_p1 = scmp.lt.s32.totalorder %s159_s26, %s159_s26 }
  0x21   : > { %p1371_p9 = scmp.ne.s32.totalorder %s159_s26, %s1370_s9  ;;  %p1379_p4 = scmp.lt.s32.totalorder %s1370_s9, %s1370_s9 }
  0x23   : > { %p1373_p10 = pnand %p1371_p9, %p1359_p13  ;;  %p1380_p8 = por %p1379_p4, %p1378_p1 }
  0x25   : > { %p1374_p6 = pneg %p1373_p10 }
  0x27   : > { %p1381_p2 = pnand %p1380_p8, %p1374_p6 }
  0x29   : > { %1384 = shalt.err (!%p1381_p2)
}
  0x2a   : > { %s1504_s10 = smov 384   ;;  %s1505_s11 = smov 24  }
  0x2b   : > { %1288 = dma.hbm_to_vmem [thread:$0]  (!%p1596_p11), %s2078_s1, 6144, %s159_s26, [#allocation6], %s1504_s10, %s1504_s10, %s1505_s11  }
  0x2c   : > { %p30_p1 = scmp.ge.s32.totalorder %s29_s28, 2  ;;  %s39_s25 = sadd.s32 1, %s1489_s14 }
  0x2d   : > { %p46_p2 = scmp.ne.s32.totalorder %s1489_s14, %s1485_s13  ;;  %p47_p4 = scmp.eq.s32.totalorder %s1501_s17, 0 }
  0x2e   : > { %s2106_s28 = smov (%p30_p1, %s29_s28), 0  ;;  %p2092_p8 = scmp.ne.s32.totalorder %s2086_s21, 0 }
  0x2f   : > { %p1623_p6 = por %p47_p4, %p46_p2  ;;  %s36_s27 = ssub.s32 %s1497_s16, %s2106_s28 }
  0x30   : > { %p1629_p10 = por %p2092_p8, %p46_p2  ;;  %p1298_p12 = scmp.lt.s32.totalorder %s1501_s17, 2 }
  0x31   : > { %p37_p11 = scmp.eq.s32.totalorder %s36_s27, 0  ;;  %s180_s26 = sand.u32 1, %s1489_s14  }
  0x32   : > { %s1055_s4 = sshll.u32 %s180_s26, 8  ;;  %s1066_s6 = sshll.u32 %s1497_s16, 12 }
  0x33   : > { %s1638_s5 = scalar_select %p37_p11, %s1489_s14, %s39_s25  }
  0x34   : > { %s1644_s9 = scalar_lea.hbm %s2077_s0, %s1066_s6  ;;  %s184_s21 = scalar_lea.vmem [#allocation2], %s1055_s4 }
  0x35   : > { %s191_s10 = sshll.u32 %s184_s21, 4  ;;  %p1650_p13 = pnand %p1298_p12, %p1623_p6  ;;  %s1646_s10 = int_to_ptr.vmem [resolvable:$true] %s191_s10 }
  0x36   : > { %s1654_s18 = scalar_lea.sflag [#allocation3], %s180_s26  ;;  %s1385_s19 = scalar_lea.hbm %s1644_s9, 4096 }
  0x37   : > { %p1386_p0 = scmp.ne.s32.totalorder %s1644_s9, %s1385_s19  ;;  %p1387_p3 = pneg %p1650_p13 }
  0x38   : > { %s1390_s29 = scalar_lea.hbm %s2077_s0, 8192  ;;  %p1391_p9 = scmp.lt.u32.totalorder %s1644_s9, %s2077_s0 }
  0x39   : > { %p1388_p5 = pnand %p1387_p3, %p1386_p0  ;;  %p1392_p1 = scmp.lt.u32.totalorder %s1390_s29, %s1385_s19 }
  0x3a   : > { %p1394_p4 = scmp.lt.u32.totalorder %s1385_s19, %s1644_s9 }
  0x3b   : > { %p1389_p7 = pneg %p1388_p5  ;;  %p1393_p2 = por %p1392_p1, %p1391_p9 }
  0x3d   : > { %p1395_p6 = por %p1394_p4, %p1393_p2 }
  0x3f   : > { %p1396_p8 = pnand %p1395_p6, %p1389_p7 }
  0x41   : > { %1399 = shalt.err (!%p1396_p8)
}
  0x42   : > { %s1400_s26 = scalar_lea.vmem %s1646_s10, 4096  ;;  %s1506_s7 = smov [#allocation2]  }
  0x43   : > { %p1401_p12 = scmp.ne.s32.totalorder %s1646_s10, %s1400_s26  ;;  %s1405_s8 = sshll.u32 %s1506_s7, 4  ;;  %s1406_s8 = int_to_ptr.vmem [resolvable:$false] %s1405_s8 }
  0x44   : > { %s1407_s21 = scalar_lea.vmem %s1406_s8, 8192  ;;  %p1408_p5 = scmp.lt.s32.totalorder %s1646_s10, %s1406_s8 }
  0x45   : > { %p1403_p11 = pnand %p1401_p12, %p1387_p3  ;;  %p1409_p9 = scmp.lt.s32.totalorder %s1407_s21, %s1400_s26 }
  0x47   : > { %p1404_p0 = pneg %p1403_p11  ;;  %p1410_p1 = por %p1409_p9, %p1408_p5 }
  0x49   : > { %p1411_p2 = pnand %p1410_p1, %p1404_p0 }
  0x4b   : > { %1414 = shalt.err (!%p1411_p2)
}
  0x4c   : > { %s1507_s19 = smov 128   ;;  %s1508_s25 = smov 8  }
  0x4d   : > { %1292 = dma.hbm_to_vmem [thread:$0]  (!%p1650_p13), %s1644_s9, 4096, %s1646_s10, %s1654_s18, %s1507_s19, %s1507_s19, %s1508_s25  }
  0x4e   : > { %p2095_p3 = scmp.ne.s32.totalorder %s2089_s24, 0 }
  0x4f   : > { %s1685_s27 = sand.u32 (!%p2095_p3), 1, %s1485_s13   ;;  %p2096_p7 = scmp.ne.s32.totalorder (!%p2095_p3), %s2087_s22, 0 }
  0x50   : > { %203 = sbr.rel (%p2095_p3) target bundleno = 448 (0x1c0), region = 32  ;;  %s1059_s29 = sshll.u32 (!%p2095_p3), %s1685_s27, 8 }
  0x51   : > { %s206_s4 = scalar_lea.sflag (!%p2095_p3), [#allocation3], %s1685_s27  ;;  %s1689_s6 = scalar_lea.vmem (!%p2095_p3), [#allocation2], %s1059_s29 }
  0x57   : > { %1468 = dma.done.wait (%p2096_p7), %s206_s4, 4096  }
  0x58   : > { %1470 = vsyncadd (%p2096_p7), %s206_s4, 4294963200  ;;  %p2097_p13 = scmp.ne.s32.totalorder %s2085_s20, 0 }
  0x5a   : > { %1472 = dma.done.wait (%p2097_p13), [#allocation6], 6144  }
  0x5b   : > { %1474 = vsyncadd (%p2097_p13), [#allocation6], 4294961152  ;;  %v1509_v0 = vmov 0.0   ;;  %v282_v1 = vld [vmem:[#allocation5 + $0x8] sm:$0xff]  ;;  %v285_v2 = vld [vmem:[#allocation5 + $0x20] sm:$0xff]  ;;  %s1275_s24 = smul.u32 768, %s1685_s27 }
  0x5c   : > { %410 = vmatprep.mubr.f32.mxu0 %v1509_v0  ;;  %554 = vmatprep.mubr.f32.mxu1 %v1509_v0  ;;  %v281_v3 = vld [vmem:[#allocation5] sm:$0xff]  ;;  %v1195_v4 = vpack.c.bf16 %v285_v2, %v282_v1  ;;  %v284_v5 = vld [vmem:[#allocation5 + $0x18] sm:$0xff]  ;;  %v291_v7 = vld [vmem:[#allocation5 + $0x50] sm:$0xff]  ;;  %s1276_s10 = smul.u32 12288, %s1493_s15  ;;  %s925_s7 = scalar_lea.sflag [#allocation4], %s1685_s27 }
  0x5d   : > { %v288_v6 = vld [vmem:[#allocation5 + $0x38] sm:$0xff]  ;;  %v1197_v8 = vpack.c.bf16 %v284_v5, %v281_v3  ;;  %v287_v10 = vld [vmem:[#allocation5 + $0x30] sm:$0xff]  ;;  %v290_v11 = vld [vmem:[#allocation5 + $0x48] sm:$0xff]  ;;  %s1827_s9 = scalar_lea.vmem [#allocation7], %s1275_s24  ;;  %s1510_s21 = smov [#allocation7]  }
  0x5e   : > { %v1199_v9 = vpack.c.bf16 %v291_v7, %v288_v6  ;;  %v294_v12 = vld [vmem:[#allocation5 + $0x68] sm:$0xff]  ;;  %1196 = vmatprep.subr.bf16.mxu0 %v1195_v4  ;;  %1259 = vmatprep.subr.bf16.mxu1 %v1195_v4  ;;  %v297_v13 = vld [vmem:[#allocation5 + $0x80] sm:$0xff]  ;;  %v1201_v14 = vpack.c.bf16 %v290_v11, %v287_v10  ;;  %v296_v17 = vld [vmem:[#allocation5 + $0x78] sm:$0xff]  ;;  %s941_s11 = sshll.u32 %s1827_s9, 4  ;;  %s2020_s26 = scalar_lea.hbm %s2080_s3, %s1276_s10  ;;  %s2022_s11 = int_to_ptr.vmem [resolvable:$true] %s941_s11 }
  0x5f   : > { %1198 = vmatpush1.bf16.msra.mxu0 %v1197_v8  ;;  %1267 = vmatpush1.bf16.msra.mxu1 %v1197_v8  ;;  %v1203_v15 = vpack.c.bf16 %v297_v13, %v294_v12  ;;  %v293_v16 = vld [vmem:[#allocation5 + $0x60] sm:$0xff]  ;;  %v300_v18 = vld [vmem:[#allocation5 + $0x98] sm:$0xff]  ;;  %v303_v19 = vld [vmem:[#allocation5 + $0xb0] sm:$0xff]  ;;  %s1415_s8 = scalar_lea.vmem %s2022_s11, 12288  ;;  %s1419_s19 = sshll.u32 %s1510_s21, 4  ;;  %s1420_s19 = int_to_ptr.vmem [resolvable:$false] %s1419_s19 }
  0x60   : > { %1200 = vmatprep.subr.bf16.mxu0 %v1199_v9  ;;  %1260 = vmatprep.subr.bf16.mxu1 %v1199_v9  ;;  %v1205_v20 = vpack.c.bf16 %v296_v17, %v293_v16  ;;  %v1207_v21 = vpack.c.bf16 %v303_v19, %v300_v18  ;;  %v299_v22 = vld [vmem:[#allocation5 + $0x90] sm:$0xff]  ;;  %v302_v23 = vld [vmem:[#allocation5 + $0xa8] sm:$0xff]  ;;  %v309_v25 = vld [vmem:[#allocation5 + $0xe0] sm:$0xff]  ;;  %p1416_p4 = scmp.ne.s32.totalorder %s2022_s11, %s1415_s8  ;;  %s1421_s25 = scalar_lea.vmem %s1420_s19, 24576 }
  0x61   : > { %v306_v24 = vld [vmem:[#allocation5 + $0xc8] sm:$0xff]  ;;  %v1209_v26 = vpack.c.bf16 %v302_v23, %v299_v22  ;;  %v305_v28 = vld [vmem:[#allocation5 + $0xc0] sm:$0xff]  ;;  %v308_v29 = vld [vmem:[#allocation5 + $0xd8] sm:$0xff]  ;;  %p1422_p12 = scmp.lt.s32.totalorder %s2022_s11, %s1420_s19  ;;  %p1423_p11 = scmp.lt.s32.totalorder %s1421_s25, %s1415_s8 }
  0x62   : > { %v1211_v27 = vpack.c.bf16 %v309_v25, %v306_v24  ;;  %v312_v30 = vld [vmem:[#allocation5 + $0xf8] sm:$0xff]  ;;  %v315_v31 = vld [vmem:[#allocation5 + $0x110] sm:$0xff]  ;;  %v1213_v32 = vpack.c.bf16 %v308_v29, %v305_v28  ;;  %v314_v35 = vld [vmem:[#allocation5 + $0x108] sm:$0xff]  ;;  %p1417_p6 = pnand %p1416_p4, %p1629_p10 }
  0x63   : > { %1202 = vmatpush1.bf16.msra.mxu0 %v1201_v14  ;;  %1268 = vmatpush1.bf16.msra.mxu1 %v1201_v14  ;;  %v1215_v33 = vpack.c.bf16 %v315_v31, %v312_v30  ;;  %v311_v34 = vld [vmem:[#allocation5 + $0xf0] sm:$0xff]  ;;  %v318_v36 = vld [vmem:[#allocation5 + $0x128] sm:$0xff]  ;;  %v321_v37 = vld [vmem:[#allocation5 + $0x140] sm:$0xff]  ;;  %p1424_p0 = por %p1423_p11, %p1422_p12 }
  0x64   : > { %1204 = vmatprep.subr.bf16.mxu0 %v1203_v15  ;;  %1261 = vmatprep.subr.bf16.mxu1 %v1203_v15  ;;  %v1217_v38 = vpack.c.bf16 %v314_v35, %v311_v34  ;;  %v1219_v39 = vpack.c.bf16 %v321_v37, %v318_v36  ;;  %v317_v40 = vld [vmem:[#allocation5 + $0x120] sm:$0xff]  ;;  %v320_v41 = vld [vmem:[#allocation5 + $0x138] sm:$0xff]  ;;  %v327_v43 = vld [vmem:[#allocation5 + $0x170] sm:$0xff]  ;;  %p1418_p8 = pneg %p1417_p6 }
  0x65   : > { %v324_v42 = vld [vmem:[#allocation5 + $0x158] sm:$0xff]  ;;  %v1221_v44 = vpack.c.bf16 %v320_v41, %v317_v40  ;;  %v323_v46 = vld [vmem:[#allocation5 + $0x150] sm:$0xff]  ;;  %v326_v47 = vld [vmem:[#allocation5 + $0x168] sm:$0xff] }
  0x66   : > { %v1223_v45 = vpack.c.bf16 %v327_v43, %v324_v42  ;;  %v283_v48 = vld [vmem:[#allocation5 + $0x10] sm:$0xff]  ;;  %v286_v49 = vld [vmem:[#allocation5 + $0x28] sm:$0xff]  ;;  %v1225_v50 = vpack.c.bf16 %v326_v47, %v323_v46  ;;  %v289_v52 = vld [vmem:[#allocation5 + $0x40] sm:$0xff]  ;;  %v331_v42 = vlaneseq  ;;  %p1425_p5 = pnand %p1424_p0, %p1418_p8 }
  0x67   : > { %1206 = vmatpush1.bf16.msra.mxu0 %v1205_v20  ;;  %1269 = vmatpush1.bf16.msra.mxu1 %v1205_v20  ;;  %v1227_v51 = vpack.c.bf16 %v286_v49, %v283_v48  ;;  %v292_v53 = vld [vmem:[#allocation5 + $0x58] sm:$0xff]  ;;  %v1702_v54 = vld [vmem:[%s1689_s6] sm:$0xff]  ;;  %v295_v57 = vld [vmem:[#allocation5 + $0x70] sm:$0xff] }
  0x68   : > { %1208 = vmatprep.subr.bf16.mxu0 %v1207_v21  ;;  %1262 = vmatprep.subr.bf16.mxu1 %v1207_v21  ;;  %v1705_v55 = vld [vmem:[%s1689_s6 + $0xc0] sm:$0xff]  ;;  %v1231_v56 = vpack.c.bf16 %v292_v53, %v289_v52  ;;  %v298_v58 = vld [vmem:[#allocation5 + $0x88] sm:$0xff]  ;;  %v304_v63 = vld [vmem:[#allocation5 + $0xb8] sm:$0xff]  ;;  %v1807_v43 = vshrl.u32 %v331_v42, 7 }
  0x69   : > { %v1711_v59 = vld [vmem:[%s1689_s6 + $0x8] sm:$0xff]  ;;  %v1235_v61 = vpack.c.bf16 %v298_v58, %v295_v57  ;;  %v301_v62 = vld [vmem:[#allocation5 + $0xa0] sm:$0xff]  ;;  %v1721_v1 = vld [vmem:[%s1689_s6 + $0x10] sm:$0xff] }
  0x6a   : > { %v1714_v60 = vld [vmem:[%s1689_s6 + $0xc8] sm:$0xff]  ;;  %v1724_v2 = vld [vmem:[%s1689_s6 + $0xd0] sm:$0xff]  ;;  %v1239_v3 = vpack.c.bf16 %v304_v63, %v301_v62  ;;  %v252_v6 = vld [vmem:[%s1689_s6 + $0x18] sm:$0xff]  ;;  %v337_v46 = vsub.s32 1, %v1807_v43 }
  0x6b   : > { %1210 = vmatpush1.bf16.msra.mxu0 %v1209_v26  ;;  %1270 = vmatpush1.bf16.msra.mxu1 %v1209_v26  ;;  %v307_v4 = vld [vmem:[#allocation5 + $0xd0] sm:$0xff]  ;;  %v310_v5 = vld [vmem:[#allocation5 + $0xe8] sm:$0xff]  ;;  %v1732_v7 = vld [vmem:[%s1689_s6 + $0xd8] sm:$0xff] }
  0x6c   : > { %1212 = vmatprep.subr.bf16.mxu0 %v1211_v27  ;;  %1263 = vmatprep.subr.bf16.mxu1 %v1211_v27  ;;  %v1243_v8 = vpack.c.bf16 %v310_v5, %v307_v4  ;;  %v313_v9 = vld [vmem:[#allocation5 + $0x100] sm:$0xff]  ;;  %v316_v10 = vld [vmem:[#allocation5 + $0x118] sm:$0xff]  ;;  %v319_v14 = vld [vmem:[#allocation5 + $0x130] sm:$0xff] }
  0x6d   : > { %v253_v11 = vld [vmem:[%s1689_s6 + $0x20] sm:$0xff]  ;;  %v1247_v13 = vpack.c.bf16 %v316_v10, %v313_v9  ;;  %v322_v15 = vld [vmem:[#allocation5 + $0x148] sm:$0xff]  ;;  %v328_v20 = vld [vmem:[#allocation5 + $0x178] sm:$0xff] }
  0x6e   : > { %v1739_v12 = vld [vmem:[%s1689_s6 + $0xe0] sm:$0xff]  ;;  %v254_v16 = vld [vmem:[%s1689_s6 + $0x28] sm:$0xff]  ;;  %v1251_v18 = vpack.c.bf16 %v322_v15, %v319_v14  ;;  %v255_v21 = vld [vmem:[%s1689_s6 + $0x30] sm:$0xff] }
  0x6f   : > { %1214 = vmatpush1.bf16.msra.mxu0 %v1213_v32  ;;  %1271 = vmatpush1.bf16.msra.mxu1 %v1213_v32  ;;  %v1746_v17 = vld [vmem:[%s1689_s6 + $0xe8] sm:$0xff]  ;;  %v325_v19 = vld [vmem:[#allocation5 + $0x160] sm:$0xff]  ;;  %v1753_v22 = vld [vmem:[%s1689_s6 + $0xf0] sm:$0xff] }
  0x70   : > { %1216 = vmatprep.subr.bf16.mxu0 %v1215_v33  ;;  %1264 = vmatprep.subr.bf16.mxu1 %v1215_v33  ;;  %v1255_v23 = vpack.c.bf16 %v328_v20, %v325_v19  ;;  %v256_v24 = vld [vmem:[%s1689_s6 + $0x38] sm:$0xff]  ;;  %v257_v26 = vld [vmem:[%s1689_s6 + $0x40] sm:$0xff]  ;;  %v258_v27 = vld [vmem:[%s1689_s6 + $0x48] sm:$0xff] }
  0x71   : > { %v1760_v25 = vld [vmem:[%s1689_s6 + $0xf8] sm:$0xff]  ;;  %v259_v28 = vld [vmem:[%s1689_s6 + $0x50] sm:$0xff]  ;;  %v261_v30 = vld [vmem:[%s1689_s6 + $0x60] sm:$0xff] }
  0x72   : > { %v260_v29 = vld [vmem:[%s1689_s6 + $0x58] sm:$0xff]  ;;  %v262_v31 = vld [vmem:[%s1689_s6 + $0x68] sm:$0xff]  ;;  %v263_v32 = vld [vmem:[%s1689_s6 + $0x70] sm:$0xff] }
  0x73   : > { %1218 = vmatpush1.bf16.msra.mxu0 %v1217_v38  ;;  %1272 = vmatpush1.bf16.msra.mxu1 %v1217_v38  ;;  %v264_v33 = vld [vmem:[%s1689_s6 + $0x78] sm:$0xff]  ;;  %v265_v34 = vld [vmem:[%s1689_s6 + $0x80] sm:$0xff]  ;;  %v266_v35 = vld [vmem:[%s1689_s6 + $0x88] sm:$0xff] }
  0x74   : > { %1220 = vmatprep.subr.bf16.mxu0 %v1219_v39  ;;  %1265 = vmatprep.subr.bf16.mxu1 %v1219_v39  ;;  %v267_v36 = vld [vmem:[%s1689_s6 + $0x90] sm:$0xff]  ;;  %v268_v37 = vld [vmem:[%s1689_s6 + $0x98] sm:$0xff]  ;;  %v269_v38 = vld [vmem:[%s1689_s6 + $0xa0] sm:$0xff] }
  0x75   : > { %v270_v39 = vld [vmem:[%s1689_s6 + $0xa8] sm:$0xff]  ;;  %v271_v40 = vld [vmem:[%s1689_s6 + $0xb0] sm:$0xff]  ;;  %v272_v41 = vld [vmem:[%s1689_s6 + $0xb8] sm:$0xff] }
  0x77   : > { %1222 = vmatpush1.bf16.msra.mxu0 %v1221_v44  ;;  %1273 = vmatpush1.bf16.msra.mxu1 %v1221_v44  ;;  %v333_v44 = vsub.s32 0, %v1807_v43 }
  0x78   : > { %1224 = vmatprep.subr.bf16.mxu0 %v1223_v45  ;;  %1266 = vmatprep.subr.bf16.mxu1 %v1223_v45  ;;  %v1813_v45 = vld [vmem:[%s2079_s2] sm:$0x7] }
  0x79   : > { %v1821_v47 = vrot.slane %v1813_v45, %v337_v46 }
  0x7b   : > { %1226 = vmatpush1.bf16.msra.mxu0 %v1225_v50  ;;  %1274 = vmatpush1.bf16.msra.mxu1 %v1225_v50 }
  0x7c   : > { %1228 = vmatprep.subr.bf16.mxu1 %v1227_v51 }
  0x7e   : > { %411 = vmatmul.mubr.f32.vlgmr.msra.gmra.mrb[0].mxu0 %v1702_v54  ;;  %555 = vmatmul.mubr.f32.vlgmr.msra.gmra.mrb[0].mxu1 %v1705_v55 }
  0x7f   : > { %1230 = vmatpush3.bf16.msra.mxu1 %v1227_v51  ;;  %416 = vmatprep.mubr.f32.mxu0 %v1509_v0 }
  0x80   : > { %560 = vmatprep.mubr.f32.mxu1 %v1509_v0  ;;  %1232 = vmatprep.subr.bf16.mxu1 %v1231_v56 }
  0x82   : > { %417 = vmatmul.mubr.f32.gmra.mrb[2].mxu0 %v1711_v59  ;;  %561 = vmatmul.mubr.f32.gmra.mrb[2].mxu1 %v1714_v60 }
  0x83   : > { %1234 = vmatpush3.bf16.msra.mxu1 %v1231_v56  ;;  %422 = vmatprep.mubr.f32.mxu0 %v1509_v0 }
  0x84   : > { %566 = vmatprep.mubr.f32.mxu1 %v1509_v0  ;;  %1236 = vmatprep.subr.bf16.mxu1 %v1235_v61 }
  0x86   : > { %423 = vmatmul.mubr.f32.gmra.mrb[4].mxu0 %v1721_v1  ;;  %567 = vmatmul.mubr.f32.gmra.mrb[4].mxu1 %v1724_v2 }
  0x87   : > { %1238 = vmatpush3.bf16.msra.mxu1 %v1235_v61  ;;  %428 = vmatprep.mubr.f32.mxu0 %v1509_v0 }
  0x88   : > { %572 = vmatprep.mubr.f32.mxu1 %v1509_v0  ;;  %1240 = vmatprep.subr.bf16.mxu1 %v1239_v3 }
  0x8a   : > { %429 = vmatmul.mubr.f32.gmra.mrb[6].mxu0 %v252_v6  ;;  %573 = vmatmul.mubr.f32.gmra.mrb[6].mxu1 %v1732_v7 }
  0x8b   : > { %1242 = vmatpush3.bf16.msra.mxu1 %v1239_v3  ;;  %434 = vmatprep.mubr.f32.mxu0 %v1509_v0 }
  0x8c   : > { %578 = vmatprep.mubr.f32.mxu1 %v1509_v0  ;;  %1244 = vmatprep.subr.bf16.mxu1 %v1243_v8 }
  0x8e   : > { %435 = vmatmul.mubr.f32.gmra.mrb[8].mxu0 %v253_v11  ;;  %579 = vmatmul.mubr.f32.gmra.mrb[8].mxu1 %v1739_v12 }
  0x8f   : > { %1246 = vmatpush3.bf16.msra.mxu1 %v1243_v8  ;;  %440 = vmatprep.mubr.f32.mxu0 %v1509_v0 }
  0x90   : > { %584 = vmatprep.mubr.f32.mxu1 %v1509_v0  ;;  %1248 = vmatprep.subr.bf16.mxu1 %v1247_v13 }
  0x92   : > { %441 = vmatmul.mubr.f32.gmra.mrb[10].mxu0 %v254_v16  ;;  %585 = vmatmul.mubr.f32.gmra.mrb[10].mxu1 %v1746_v17 }
  0x93   : > { %1250 = vmatpush3.bf16.msra.mxu1 %v1247_v13  ;;  %446 = vmatprep.mubr.f32.mxu0 %v1509_v0 }
  0x94   : > { %590 = vmatprep.mubr.f32.mxu1 %v1509_v0  ;;  %1252 = vmatprep.subr.bf16.mxu1 %v1251_v18 }
  0x96   : > { %447 = vmatmul.mubr.f32.gmra.mrb[12].mxu0 %v255_v21  ;;  %591 = vmatmul.mubr.f32.gmra.mrb[12].mxu1 %v1753_v22 }
  0x97   : > { %1254 = vmatpush3.bf16.msra.mxu1 %v1251_v18  ;;  %452 = vmatprep.mubr.f32.mxu0 %v1509_v0 }
  0x98   : > { %596 = vmatprep.mubr.f32.mxu1 %v1509_v0  ;;  %1256 = vmatprep.subr.bf16.mxu1 %v1255_v23 }
  0x9a   : > { %453 = vmatmul.mubr.f32.gmra.mrb[14].mxu0 %v256_v24  ;;  %597 = vmatmul.mubr.f32.gmra.mrb[14].mxu1 %v1760_v25 }
  0x9b   : > { %1258 = vmatpush3.bf16.msra.mxu1 %v1255_v23  ;;  %458 = vmatprep.mubr.f32.mxu0 %v1509_v0 }
  0x9c   : > { %1147 = vmatprep.mubr.f32.mxu1 %v1702_v54 }
  0x9e   : > { %459 = vmatmul.mubr.f32.gmra.mrb[16].mxu0 %v257_v26  ;;  %1148 = vmatmul.mubr.f32.vlgmr.msra.gmra.mrb[16].mxu1 %v1711_v59 }
  0x9f   : > { %464 = vmatprep.mubr.f32.mxu0 %v1509_v0  ;;  %1150 = vmatprep.mubr.f32.mxu1 %v1721_v1 }
  0xa2   : > { %465 = vmatmul.mubr.f32.gmra.mrb[18].mxu0 %v258_v27  ;;  %1151 = vmatmul.mubr.f32.gmra.mrb[18].mxu1 %v252_v6 }
  0xa3   : > { %470 = vmatprep.mubr.f32.mxu0 %v1509_v0  ;;  %1153 = vmatprep.mubr.f32.mxu1 %v253_v11 }
  0xa6   : > { %471 = vmatmul.mubr.f32.gmra.mrb[20].mxu0 %v259_v28  ;;  %1154 = vmatmul.mubr.f32.gmra.mrb[20].mxu1 %v254_v16 }
  0xa7   : > { %476 = vmatprep.mubr.f32.mxu0 %v1509_v0  ;;  %1156 = vmatprep.mubr.f32.mxu1 %v255_v21 }
  0xaa   : > { %477 = vmatmul.mubr.f32.gmra.mrb[22].mxu0 %v260_v29  ;;  %1157 = vmatmul.mubr.f32.gmra.mrb[22].mxu1 %v256_v24 }
  0xab   : > { %482 = vmatprep.mubr.f32.mxu0 %v1509_v0  ;;  %1159 = vmatprep.mubr.f32.mxu1 %v257_v26 }
  0xae   : > { %483 = vmatmul.mubr.f32.gmra.mrb[24].mxu0 %v261_v30  ;;  %1160 = vmatmul.mubr.f32.gmra.mrb[24].mxu1 %v258_v27 }
  0xaf   : > { %488 = vmatprep.mubr.f32.mxu0 %v1509_v0  ;;  %1162 = vmatprep.mubr.f32.mxu1 %v259_v28 }
  0xb2   : > { %489 = vmatmul.mubr.f32.gmra.mrb[26].mxu0 %v262_v31  ;;  %1163 = vmatmul.mubr.f32.gmra.mrb[26].mxu1 %v260_v29 }
  0xb3   : > { %494 = vmatprep.mubr.f32.mxu0 %v1509_v0  ;;  %1165 = vmatprep.mubr.f32.mxu1 %v261_v30 }
  0xb6   : > { %495 = vmatmul.mubr.f32.gmra.mrb[28].mxu0 %v263_v32  ;;  %1166 = vmatmul.mubr.f32.gmra.mrb[28].mxu1 %v262_v31 }
  0xb7   : > { %500 = vmatprep.mubr.f32.mxu0 %v1509_v0  ;;  %1168 = vmatprep.mubr.f32.mxu1 %v263_v32 }
  0xba   : > { %501 = vmatmul.mubr.f32.gmra.mrb[30].mxu0 %v264_v33  ;;  %1169 = vmatmul.mubr.f32.gmra.mrb[30].mxu1 %v264_v33 }
  0xbb   : > { %506 = vmatprep.mubr.f32.mxu0 %v1509_v0  ;;  %1171 = vmatprep.mubr.f32.mxu1 %v265_v34 }
  0xbe   : > { %507 = vmatmul.mubr.f32.gmra.mrb[32].mxu0 %v265_v34  ;;  %1172 = vmatmul.mubr.f32.gmra.mrb[32].mxu1 %v266_v35 }
  0xbf   : > { %512 = vmatprep.mubr.f32.mxu0 %v1509_v0  ;;  %1174 = vmatprep.mubr.f32.mxu1 %v267_v36 }
  0xc2   : > { %513 = vmatmul.mubr.f32.gmra.mrb[34].mxu0 %v266_v35  ;;  %1175 = vmatmul.mubr.f32.gmra.mrb[34].mxu1 %v268_v37 }
  0xc3   : > { %518 = vmatprep.mubr.f32.mxu0 %v1509_v0  ;;  %1177 = vmatprep.mubr.f32.mxu1 %v269_v38 }
  0xc6   : > { %519 = vmatmul.mubr.f32.gmra.mrb[36].mxu0 %v267_v36  ;;  %1178 = vmatmul.mubr.f32.gmra.mrb[36].mxu1 %v270_v39 }
  0xc7   : > { %524 = vmatprep.mubr.f32.mxu0 %v1509_v0  ;;  %1180 = vmatprep.mubr.f32.mxu1 %v271_v40 }
  0xca   : > { %525 = vmatmul.mubr.f32.gmra.mrb[38].mxu0 %v268_v37  ;;  %1181 = vmatmul.mubr.f32.gmra.mrb[38].mxu1 %v272_v41 }
  0xcb   : > { %530 = vmatprep.mubr.f32.mxu0 %v1509_v0  ;;  %1183 = vmatprep.mubr.f32.mxu1 %v1705_v55 }
  0xce   : > { %531 = vmatmul.mubr.f32.gmra.mrb[40].mxu0 %v269_v38  ;;  %1184 = vmatmul.mubr.f32.gmra.mrb[40].mxu1 %v1714_v60 }
  0xcf   : > { %536 = vmatprep.mubr.f32.mxu0 %v1509_v0  ;;  %1186 = vmatprep.mubr.f32.mxu1 %v1724_v2 }
  0xd2   : > { %537 = vmatmul.mubr.f32.gmra.mrb[42].mxu0 %v270_v39  ;;  %1187 = vmatmul.mubr.f32.gmra.mrb[42].mxu1 %v1732_v7  ;;  %v341_v39 = vsub.s32 2, %v1807_v43 }
  0xd3   : > { %542 = vmatprep.mubr.f32.mxu0 %v1509_v0  ;;  %1189 = vmatprep.mubr.f32.mxu1 %v1739_v12 }
  0xd6   : > { %543 = vmatmul.mubr.f32.gmra.mrb[44].mxu0 %v271_v40  ;;  %1190 = vmatmul.mubr.f32.gmra.mrb[44].mxu1 %v1746_v17 }
  0xd7   : > { %548 = vmatprep.mubr.f32.mxu0 %v1509_v0  ;;  %1192 = vmatprep.mubr.f32.mxu1 %v1753_v22  ;;  %v1818_v0 = vrot.slane %v1813_v45, %v333_v44 }
  0xda   : > { %549 = vmatmul.mubr.f32.gmra.mrb[46].mxu0 %v272_v41  ;;  %1193 = vmatmul.mubr.f32.gmra.mrb[46].mxu1 %v1760_v25 }
 0x151   : > { %v412_v48 = vpop.f32.mrb[0].mxu0  ;;  %v556_v49 = vpop.f32.mrb[0].mxu1 }
 0x152   : > { %v413_v50 = vadd.f32 %v412_v48, %v1818_v0  ;;  %v557_v51 = vadd.f32 %v556_v49, %v1818_v0  ;;  %v414_v52 = vpop.f32.mrb[1].mxu0  ;;  %v558_v53 = vpop.f32.mrb[1].mxu1 }
 0x153   : > { %v415_v54 = vadd.f32 %v414_v52, %v1821_v47  ;;  %v559_v55 = vadd.f32 %v558_v53, %v1821_v47 }
 0x154   : > { %828 = vst [vmem:[%s1827_s9] sm:$0xff] %v413_v50  ;;  %900 = vst [vmem:[%s1827_s9 + $0x240] sm:$0xff] %v557_v51  ;;  %v1885_v50 = vrot.slane %v1813_v45, %v341_v39 }
 0x155   : > { %829 = vst [vmem:[%s1827_s9 + $0x8] sm:$0xff] %v415_v54  ;;  %901 = vst [vmem:[%s1827_s9 + $0x248] sm:$0xff] %v559_v55  ;;  %v418_v56 = vpop.f32.mrb[2].mxu0  ;;  %v562_v57 = vpop.f32.mrb[2].mxu1 }
 0x156   : > { %v419_v58 = vadd.f32 %v418_v56, %v1818_v0  ;;  %v563_v59 = vadd.f32 %v562_v57, %v1818_v0  ;;  %v420_v60 = vpop.f32.mrb[3].mxu0  ;;  %v564_v61 = vpop.f32.mrb[3].mxu1 }
 0x157   : > { %v421_v62 = vadd.f32 %v420_v60, %v1821_v47  ;;  %v565_v63 = vadd.f32 %v564_v61, %v1821_v47 }
 0x158   : > { %831 = vst [vmem:[%s1827_s9 + $0x18] sm:$0xff] %v419_v58  ;;  %903 = vst [vmem:[%s1827_s9 + $0x258] sm:$0xff] %v563_v59 }
 0x159   : > { %832 = vst [vmem:[%s1827_s9 + $0x20] sm:$0xff] %v421_v62  ;;  %904 = vst [vmem:[%s1827_s9 + $0x260] sm:$0xff] %v565_v63  ;;  %v424_v1 = vpop.f32.mrb[4].mxu0  ;;  %v568_v2 = vpop.f32.mrb[4].mxu1 }
 0x15a   : > { %v425_v3 = vadd.f32 %v424_v1, %v1818_v0  ;;  %v569_v4 = vadd.f32 %v568_v2, %v1818_v0  ;;  %v426_v5 = vpop.f32.mrb[5].mxu0  ;;  %v570_v6 = vpop.f32.mrb[5].mxu1 }
 0x15b   : > { %v427_v7 = vadd.f32 %v426_v5, %v1821_v47  ;;  %v571_v8 = vadd.f32 %v570_v6, %v1821_v47 }
 0x15c   : > { %834 = vst [vmem:[%s1827_s9 + $0x30] sm:$0xff] %v425_v3  ;;  %906 = vst [vmem:[%s1827_s9 + $0x270] sm:$0xff] %v569_v4 }
 0x15d   : > { %835 = vst [vmem:[%s1827_s9 + $0x38] sm:$0xff] %v427_v7  ;;  %907 = vst [vmem:[%s1827_s9 + $0x278] sm:$0xff] %v571_v8  ;;  %v430_v9 = vpop.f32.mrb[6].mxu0  ;;  %v574_v10 = vpop.f32.mrb[6].mxu1 }
 0x15e   : > { %v431_v11 = vadd.f32 %v430_v9, %v1818_v0  ;;  %v575_v12 = vadd.f32 %v574_v10, %v1818_v0  ;;  %v432_v13 = vpop.f32.mrb[7].mxu0  ;;  %v576_v14 = vpop.f32.mrb[7].mxu1 }
 0x15f   : > { %v433_v15 = vadd.f32 %v432_v13, %v1821_v47  ;;  %v577_v16 = vadd.f32 %v576_v14, %v1821_v47 }
 0x160   : > { %837 = vst [vmem:[%s1827_s9 + $0x48] sm:$0xff] %v431_v11  ;;  %909 = vst [vmem:[%s1827_s9 + $0x288] sm:$0xff] %v575_v12 }
 0x161   : > { %838 = vst [vmem:[%s1827_s9 + $0x50] sm:$0xff] %v433_v15  ;;  %910 = vst [vmem:[%s1827_s9 + $0x290] sm:$0xff] %v577_v16  ;;  %v436_v17 = vpop.f32.mrb[8].mxu0  ;;  %v580_v18 = vpop.f32.mrb[8].mxu1 }
 0x162   : > { %v437_v19 = vadd.f32 %v436_v17, %v1818_v0  ;;  %v581_v20 = vadd.f32 %v580_v18, %v1818_v0  ;;  %v438_v21 = vpop.f32.mrb[9].mxu0  ;;  %v582_v22 = vpop.f32.mrb[9].mxu1 }
 0x163   : > { %v439_v23 = vadd.f32 %v438_v21, %v1821_v47  ;;  %v583_v24 = vadd.f32 %v582_v22, %v1821_v47 }
 0x164   : > { %840 = vst [vmem:[%s1827_s9 + $0x60] sm:$0xff] %v437_v19  ;;  %912 = vst [vmem:[%s1827_s9 + $0x2a0] sm:$0xff] %v581_v20 }
 0x165   : > { %841 = vst [vmem:[%s1827_s9 + $0x68] sm:$0xff] %v439_v23  ;;  %913 = vst [vmem:[%s1827_s9 + $0x2a8] sm:$0xff] %v583_v24  ;;  %v442_v25 = vpop.f32.mrb[10].mxu0  ;;  %v586_v26 = vpop.f32.mrb[10].mxu1 }
 0x166   : > { %v443_v27 = vadd.f32 %v442_v25, %v1818_v0  ;;  %v587_v28 = vadd.f32 %v586_v26, %v1818_v0  ;;  %v444_v29 = vpop.f32.mrb[11].mxu0  ;;  %v588_v30 = vpop.f32.mrb[11].mxu1 }
 0x167   : > { %v445_v31 = vadd.f32 %v444_v29, %v1821_v47  ;;  %v589_v32 = vadd.f32 %v588_v30, %v1821_v47 }
 0x168   : > { %843 = vst [vmem:[%s1827_s9 + $0x78] sm:$0xff] %v443_v27  ;;  %915 = vst [vmem:[%s1827_s9 + $0x2b8] sm:$0xff] %v587_v28 }
 0x169   : > { %844 = vst [vmem:[%s1827_s9 + $0x80] sm:$0xff] %v445_v31  ;;  %916 = vst [vmem:[%s1827_s9 + $0x2c0] sm:$0xff] %v589_v32  ;;  %v448_v33 = vpop.f32.mrb[12].mxu0  ;;  %v592_v34 = vpop.f32.mrb[12].mxu1 }
 0x16a   : > { %v449_v35 = vadd.f32 %v448_v33, %v1818_v0  ;;  %v593_v36 = vadd.f32 %v592_v34, %v1818_v0  ;;  %v450_v37 = vpop.f32.mrb[13].mxu0  ;;  %v594_v38 = vpop.f32.mrb[13].mxu1 }
 0x16b   : > { %v451_v40 = vadd.f32 %v450_v37, %v1821_v47  ;;  %v595_v41 = vadd.f32 %v594_v38, %v1821_v47 }
 0x16c   : > { %846 = vst [vmem:[%s1827_s9 + $0x90] sm:$0xff] %v449_v35  ;;  %918 = vst [vmem:[%s1827_s9 + $0x2d0] sm:$0xff] %v593_v36 }
 0x16d   : > { %847 = vst [vmem:[%s1827_s9 + $0x98] sm:$0xff] %v451_v40  ;;  %919 = vst [vmem:[%s1827_s9 + $0x2d8] sm:$0xff] %v595_v41  ;;  %v454_v42 = vpop.f32.mrb[14].mxu0  ;;  %v598_v44 = vpop.f32.mrb[14].mxu1 }
 0x16e   : > { %v455_v46 = vadd.f32 %v454_v42, %v1818_v0  ;;  %v599_v48 = vadd.f32 %v598_v44, %v1818_v0  ;;  %v456_v49 = vpop.f32.mrb[15].mxu0  ;;  %v600_v43 = vpop.f32.mrb[15].mxu1 }
 0x16f   : > { %v457_v51 = vadd.f32 %v456_v49, %v1821_v47  ;;  %v601_v52 = vadd.f32 %v600_v43, %v1821_v47 }
 0x170   : > { %849 = vst [vmem:[%s1827_s9 + $0xa8] sm:$0xff] %v455_v46  ;;  %921 = vst [vmem:[%s1827_s9 + $0x2e8] sm:$0xff] %v599_v48 }
 0x171   : > { %850 = vst [vmem:[%s1827_s9 + $0xb0] sm:$0xff] %v457_v51  ;;  %922 = vst [vmem:[%s1827_s9 + $0x2f0] sm:$0xff] %v601_v52  ;;  %v460_v53 = vpop.f32.mrb[16].mxu0  ;;  %v1149_v54 = vpop.f32.mrb[16].mxu1 }
 0x172   : > { %v461_v55 = vadd.f32 %v460_v53, %v1818_v0  ;;  %v675_v56 = vadd.f32 %v1149_v54, %v1885_v50  ;;  %v462_v57 = vpop.f32.mrb[17].mxu0  ;;  %v669_v45 = vpop.f32.mrb[17].mxu1 }
 0x173   : > { %v463_v58 = vadd.f32 %v462_v57, %v1821_v47  ;;  %v670_v59 = vadd.f32 %v669_v45, %v1885_v50 }
 0x174   : > { %852 = vst [vmem:[%s1827_s9 + $0xc0] sm:$0xff] %v461_v55  ;;  %833 = vst [vmem:[%s1827_s9 + $0x28] sm:$0xff] %v675_v56 }
 0x175   : > { %853 = vst [vmem:[%s1827_s9 + $0xc8] sm:$0xff] %v463_v58  ;;  %830 = vst [vmem:[%s1827_s9 + $0x10] sm:$0xff] %v670_v59  ;;  %v466_v60 = vpop.f32.mrb[18].mxu0  ;;  %v1152_v61 = vpop.f32.mrb[18].mxu1 }
 0x176   : > { %v467_v62 = vadd.f32 %v466_v60, %v1818_v0  ;;  %v685_v63 = vadd.f32 %v1152_v61, %v1885_v50  ;;  %v468_v1 = vpop.f32.mrb[19].mxu0  ;;  %v679_v2 = vpop.f32.mrb[19].mxu1 }
 0x177   : > { %v469_v3 = vadd.f32 %v468_v1, %v1821_v47  ;;  %v680_v4 = vadd.f32 %v679_v2, %v1885_v50 }
 0x178   : > { %855 = vst [vmem:[%s1827_s9 + $0xd8] sm:$0xff] %v467_v62  ;;  %839 = vst [vmem:[%s1827_s9 + $0x58] sm:$0xff] %v685_v63 }
 0x179   : > { %856 = vst [vmem:[%s1827_s9 + $0xe0] sm:$0xff] %v469_v3  ;;  %836 = vst [vmem:[%s1827_s9 + $0x40] sm:$0xff] %v680_v4  ;;  %v472_v5 = vpop.f32.mrb[20].mxu0  ;;  %v1155_v6 = vpop.f32.mrb[20].mxu1 }
 0x17a   : > { %v473_v7 = vadd.f32 %v472_v5, %v1818_v0  ;;  %v695_v8 = vadd.f32 %v1155_v6, %v1885_v50  ;;  %v474_v9 = vpop.f32.mrb[21].mxu0  ;;  %v689_v10 = vpop.f32.mrb[21].mxu1 }
 0x17b   : > { %v475_v11 = vadd.f32 %v474_v9, %v1821_v47  ;;  %v690_v12 = vadd.f32 %v689_v10, %v1885_v50 }
 0x17c   : > { %858 = vst [vmem:[%s1827_s9 + $0xf0] sm:$0xff] %v473_v7  ;;  %845 = vst [vmem:[%s1827_s9 + $0x88] sm:$0xff] %v695_v8 }
 0x17d   : > { %859 = vst [vmem:[%s1827_s9 + $0xf8] sm:$0xff] %v475_v11  ;;  %842 = vst [vmem:[%s1827_s9 + $0x70] sm:$0xff] %v690_v12  ;;  %v478_v13 = vpop.f32.mrb[22].mxu0  ;;  %v1158_v14 = vpop.f32.mrb[22].mxu1 }
 0x17e   : > { %v479_v15 = vadd.f32 %v478_v13, %v1818_v0  ;;  %v705_v16 = vadd.f32 %v1158_v14, %v1885_v50  ;;  %v480_v17 = vpop.f32.mrb[23].mxu0  ;;  %v699_v18 = vpop.f32.mrb[23].mxu1 }
 0x17f   : > { %v481_v19 = vadd.f32 %v480_v17, %v1821_v47  ;;  %v700_v20 = vadd.f32 %v699_v18, %v1885_v50 }
 0x180   : > { %861 = vst [vmem:[%s1827_s9 + $0x108] sm:$0xff] %v479_v15  ;;  %851 = vst [vmem:[%s1827_s9 + $0xb8] sm:$0xff] %v705_v16 }
 0x181   : > { %862 = vst [vmem:[%s1827_s9 + $0x110] sm:$0xff] %v481_v19  ;;  %848 = vst [vmem:[%s1827_s9 + $0xa0] sm:$0xff] %v700_v20  ;;  %v484_v21 = vpop.f32.mrb[24].mxu0  ;;  %v1161_v22 = vpop.f32.mrb[24].mxu1 }
 0x182   : > { %v485_v23 = vadd.f32 %v484_v21, %v1818_v0  ;;  %v715_v24 = vadd.f32 %v1161_v22, %v1885_v50  ;;  %v486_v25 = vpop.f32.mrb[25].mxu0  ;;  %v709_v26 = vpop.f32.mrb[25].mxu1 }
 0x183   : > { %v487_v27 = vadd.f32 %v486_v25, %v1821_v47  ;;  %v710_v28 = vadd.f32 %v709_v26, %v1885_v50 }
 0x184   : > { %864 = vst [vmem:[%s1827_s9 + $0x120] sm:$0xff] %v485_v23  ;;  %857 = vst [vmem:[%s1827_s9 + $0xe8] sm:$0xff] %v715_v24 }
 0x185   : > { %865 = vst [vmem:[%s1827_s9 + $0x128] sm:$0xff] %v487_v27  ;;  %854 = vst [vmem:[%s1827_s9 + $0xd0] sm:$0xff] %v710_v28  ;;  %v490_v29 = vpop.f32.mrb[26].mxu0  ;;  %v1164_v30 = vpop.f32.mrb[26].mxu1 }
 0x186   : > { %v491_v31 = vadd.f32 %v490_v29, %v1818_v0  ;;  %v725_v32 = vadd.f32 %v1164_v30, %v1885_v50  ;;  %v492_v33 = vpop.f32.mrb[27].mxu0  ;;  %v719_v34 = vpop.f32.mrb[27].mxu1 }
 0x187   : > { %v493_v35 = vadd.f32 %v492_v33, %v1821_v47  ;;  %v720_v36 = vadd.f32 %v719_v34, %v1885_v50 }
 0x188   : > { %867 = vst [vmem:[%s1827_s9 + $0x138] sm:$0xff] %v491_v31  ;;  %863 = vst [vmem:[%s1827_s9 + $0x118] sm:$0xff] %v725_v32 }
 0x189   : > { %868 = vst [vmem:[%s1827_s9 + $0x140] sm:$0xff] %v493_v35  ;;  %860 = vst [vmem:[%s1827_s9 + $0x100] sm:$0xff] %v720_v36  ;;  %v496_v37 = vpop.f32.mrb[28].mxu0  ;;  %v1167_v38 = vpop.f32.mrb[28].mxu1 }
 0x18a   : > { %v497_v39 = vadd.f32 %v496_v37, %v1818_v0  ;;  %v735_v40 = vadd.f32 %v1167_v38, %v1885_v50  ;;  %v498_v41 = vpop.f32.mrb[29].mxu0  ;;  %v729_v42 = vpop.f32.mrb[29].mxu1 }
 0x18b   : > { %v499_v44 = vadd.f32 %v498_v41, %v1821_v47  ;;  %v730_v46 = vadd.f32 %v729_v42, %v1885_v50 }
 0x18c   : > { %870 = vst [vmem:[%s1827_s9 + $0x150] sm:$0xff] %v497_v39  ;;  %869 = vst [vmem:[%s1827_s9 + $0x148] sm:$0xff] %v735_v40 }
 0x18d   : > { %871 = vst [vmem:[%s1827_s9 + $0x158] sm:$0xff] %v499_v44  ;;  %866 = vst [vmem:[%s1827_s9 + $0x130] sm:$0xff] %v730_v46  ;;  %v502_v48 = vpop.f32.mrb[30].mxu0  ;;  %v1170_v49 = vpop.f32.mrb[30].mxu1 }
 0x18e   : > { %v503_v43 = vadd.f32 %v502_v48, %v1818_v0  ;;  %v745_v51 = vadd.f32 %v1170_v49, %v1885_v50  ;;  %v504_v52 = vpop.f32.mrb[31].mxu0  ;;  %v739_v53 = vpop.f32.mrb[31].mxu1 }
 0x18f   : > { %v505_v54 = vadd.f32 %v504_v52, %v1821_v47  ;;  %v740_v55 = vadd.f32 %v739_v53, %v1885_v50 }
 0x190   : > { %873 = vst [vmem:[%s1827_s9 + $0x168] sm:$0xff] %v503_v43  ;;  %875 = vst [vmem:[%s1827_s9 + $0x178] sm:$0xff] %v745_v51 }
 0x191   : > { %874 = vst [vmem:[%s1827_s9 + $0x170] sm:$0xff] %v505_v54  ;;  %872 = vst [vmem:[%s1827_s9 + $0x160] sm:$0xff] %v740_v55  ;;  %v508_v56 = vpop.f32.mrb[32].mxu0  ;;  %v1173_v57 = vpop.f32.mrb[32].mxu1 }
 0x192   : > { %v509_v45 = vadd.f32 %v508_v56, %v1818_v0  ;;  %v755_v58 = vadd.f32 %v1173_v57, %v1885_v50  ;;  %v510_v59 = vpop.f32.mrb[33].mxu0  ;;  %v749_v60 = vpop.f32.mrb[33].mxu1 }
 0x193   : > { %v511_v61 = vadd.f32 %v510_v59, %v1821_v47  ;;  %v750_v62 = vadd.f32 %v749_v60, %v1885_v50 }
 0x194   : > { %876 = vst [vmem:[%s1827_s9 + $0x180] sm:$0xff] %v509_v45  ;;  %881 = vst [vmem:[%s1827_s9 + $0x1a8] sm:$0xff] %v755_v58 }
 0x195   : > { %877 = vst [vmem:[%s1827_s9 + $0x188] sm:$0xff] %v511_v61  ;;  %878 = vst [vmem:[%s1827_s9 + $0x190] sm:$0xff] %v750_v62  ;;  %v514_v63 = vpop.f32.mrb[34].mxu0  ;;  %v1176_v1 = vpop.f32.mrb[34].mxu1 }
 0x196   : > { %v515_v2 = vadd.f32 %v514_v63, %v1818_v0  ;;  %v765_v3 = vadd.f32 %v1176_v1, %v1885_v50  ;;  %v516_v4 = vpop.f32.mrb[35].mxu0  ;;  %v759_v5 = vpop.f32.mrb[35].mxu1 }
 0x197   : > { %v517_v6 = vadd.f32 %v516_v4, %v1821_v47  ;;  %v760_v7 = vadd.f32 %v759_v5, %v1885_v50 }
 0x198   : > { %879 = vst [vmem:[%s1827_s9 + $0x198] sm:$0xff] %v515_v2  ;;  %887 = vst [vmem:[%s1827_s9 + $0x1d8] sm:$0xff] %v765_v3 }
 0x199   : > { %880 = vst [vmem:[%s1827_s9 + $0x1a0] sm:$0xff] %v517_v6  ;;  %884 = vst [vmem:[%s1827_s9 + $0x1c0] sm:$0xff] %v760_v7  ;;  %v520_v8 = vpop.f32.mrb[36].mxu0  ;;  %v1179_v9 = vpop.f32.mrb[36].mxu1 }
 0x19a   : > { %v521_v10 = vadd.f32 %v520_v8, %v1818_v0  ;;  %v775_v11 = vadd.f32 %v1179_v9, %v1885_v50  ;;  %v522_v12 = vpop.f32.mrb[37].mxu0  ;;  %v769_v13 = vpop.f32.mrb[37].mxu1 }
 0x19b   : > { %v523_v14 = vadd.f32 %v522_v12, %v1821_v47  ;;  %v770_v15 = vadd.f32 %v769_v13, %v1885_v50 }
 0x19c   : > { %882 = vst [vmem:[%s1827_s9 + $0x1b0] sm:$0xff] %v521_v10  ;;  %893 = vst [vmem:[%s1827_s9 + $0x208] sm:$0xff] %v775_v11 }
 0x19d   : > { %883 = vst [vmem:[%s1827_s9 + $0x1b8] sm:$0xff] %v523_v14  ;;  %890 = vst [vmem:[%s1827_s9 + $0x1f0] sm:$0xff] %v770_v15  ;;  %v526_v16 = vpop.f32.mrb[38].mxu0  ;;  %v1182_v17 = vpop.f32.mrb[38].mxu1 }
 0x19e   : > { %v527_v18 = vadd.f32 %v526_v16, %v1818_v0  ;;  %v785_v19 = vadd.f32 %v1182_v17, %v1885_v50  ;;  %v528_v20 = vpop.f32.mrb[39].mxu0  ;;  %v779_v21 = vpop.f32.mrb[39].mxu1 }
 0x19f   : > { %v529_v22 = vadd.f32 %v528_v20, %v1821_v47  ;;  %v780_v23 = vadd.f32 %v779_v21, %v1885_v50 }
 0x1a0   : > { %885 = vst [vmem:[%s1827_s9 + $0x1c8] sm:$0xff] %v527_v18  ;;  %899 = vst [vmem:[%s1827_s9 + $0x238] sm:$0xff] %v785_v19 }
 0x1a1   : > { %886 = vst [vmem:[%s1827_s9 + $0x1d0] sm:$0xff] %v529_v22  ;;  %896 = vst [vmem:[%s1827_s9 + $0x220] sm:$0xff] %v780_v23  ;;  %v532_v24 = vpop.f32.mrb[40].mxu0  ;;  %v1185_v25 = vpop.f32.mrb[40].mxu1 }
 0x1a2   : > { %v533_v26 = vadd.f32 %v532_v24, %v1818_v0  ;;  %v795_v27 = vadd.f32 %v1185_v25, %v1885_v50  ;;  %v534_v28 = vpop.f32.mrb[41].mxu0  ;;  %v789_v29 = vpop.f32.mrb[41].mxu1 }
 0x1a3   : > { %v535_v30 = vadd.f32 %v534_v28, %v1821_v47  ;;  %v790_v31 = vadd.f32 %v789_v29, %v1885_v50 }
 0x1a4   : > { %888 = vst [vmem:[%s1827_s9 + $0x1e0] sm:$0xff] %v533_v26  ;;  %905 = vst [vmem:[%s1827_s9 + $0x268] sm:$0xff] %v795_v27 }
 0x1a5   : > { %889 = vst [vmem:[%s1827_s9 + $0x1e8] sm:$0xff] %v535_v30  ;;  %902 = vst [vmem:[%s1827_s9 + $0x250] sm:$0xff] %v790_v31  ;;  %v538_v32 = vpop.f32.mrb[42].mxu0  ;;  %v1188_v33 = vpop.f32.mrb[42].mxu1 }
 0x1a6   : > { %v539_v34 = vadd.f32 %v538_v32, %v1818_v0  ;;  %v805_v35 = vadd.f32 %v1188_v33, %v1885_v50  ;;  %v540_v36 = vpop.f32.mrb[43].mxu0  ;;  %v799_v37 = vpop.f32.mrb[43].mxu1 }
 0x1a7   : > { %v541_v38 = vadd.f32 %v540_v36, %v1821_v47  ;;  %v800_v39 = vadd.f32 %v799_v37, %v1885_v50 }
 0x1a8   : > { %891 = vst [vmem:[%s1827_s9 + $0x1f8] sm:$0xff] %v539_v34  ;;  %911 = vst [vmem:[%s1827_s9 + $0x298] sm:$0xff] %v805_v35 }
 0x1a9   : > { %892 = vst [vmem:[%s1827_s9 + $0x200] sm:$0xff] %v541_v38  ;;  %908 = vst [vmem:[%s1827_s9 + $0x280] sm:$0xff] %v800_v39  ;;  %v544_v40 = vpop.f32.mrb[44].mxu0  ;;  %v1191_v41 = vpop.f32.mrb[44].mxu1 }
 0x1aa   : > { %v545_v42 = vadd.f32 %v544_v40, %v1818_v0  ;;  %v815_v44 = vadd.f32 %v1191_v41, %v1885_v50  ;;  %v546_v46 = vpop.f32.mrb[45].mxu0  ;;  %v809_v48 = vpop.f32.mrb[45].mxu1 }
 0x1ab   : > { %v547_v49 = vadd.f32 %v546_v46, %v1821_v47  ;;  %v810_v43 = vadd.f32 %v809_v48, %v1885_v50 }
 0x1ac   : > { %894 = vst [vmem:[%s1827_s9 + $0x210] sm:$0xff] %v545_v42  ;;  %917 = vst [vmem:[%s1827_s9 + $0x2c8] sm:$0xff] %v815_v44 }
 0x1ad   : > { %895 = vst [vmem:[%s1827_s9 + $0x218] sm:$0xff] %v547_v49  ;;  %914 = vst [vmem:[%s1827_s9 + $0x2b0] sm:$0xff] %v810_v43  ;;  %v550_v51 = vpop.f32.mrb[46].mxu0  ;;  %v1194_v52 = vpop.f32.mrb[46].mxu1 }
 0x1ae   : > { %v551_v53 = vadd.f32 %v550_v51, %v1818_v0  ;;  %v825_v54 = vadd.f32 %v1194_v52, %v1885_v50  ;;  %v552_v55 = vpop.f32.mrb[47].mxu0  ;;  %v819_v56 = vpop.f32.mrb[47].mxu1 }
 0x1af   : > { %v553_v57 = vadd.f32 %v552_v55, %v1821_v47  ;;  %v820_v45 = vadd.f32 %v819_v56, %v1885_v50 }
 0x1b0   : > { %897 = vst [vmem:[%s1827_s9 + $0x228] sm:$0xff] %v551_v53  ;;  %923 = vst [vmem:[%s1827_s9 + $0x2f8] sm:$0xff] %v825_v54 }
 0x1b1   : > { %898 = vst [vmem:[%s1827_s9 + $0x230] sm:$0xff] %v553_v57  ;;  %920 = vst [vmem:[%s1827_s9 + $0x2e0] sm:$0xff] %v820_v45 }
 0x1b2   : > { %1428 = shalt.err (!%p1425_p5)
}
 0x1b3   : > { %s1429_s29 = scalar_lea.hbm %s2020_s26, 12288  ;;  %s1433_s20 = scalar_lea.hbm %s2080_s3, 24576 }
 0x1b4   : > { %p1430_p9 = scmp.ne.s32.totalorder %s2020_s26, %s1429_s29  ;;  %p1434_p3 = scmp.lt.u32.totalorder %s2020_s26, %s2080_s3 }
 0x1b5   : > { %p1435_p7 = scmp.lt.u32.totalorder %s1433_s20, %s1429_s29  ;;  %p1437_p4 = scmp.lt.u32.totalorder %s1429_s29, %s2020_s26 }
 0x1b6   : > { %p1431_p1 = pnand %p1430_p9, %p1629_p10 }
 0x1b7   : > { %p1436_p13 = por %p1435_p7, %p1434_p3 }
 0x1b8   : > { %p1432_p2 = pneg %p1431_p1 }
 0x1b9   : > { %p1438_p6 = por %p1437_p4, %p1436_p13 }
 0x1bb   : > { %p1439_p8 = pnand %p1438_p6, %p1432_p2 }
 0x1bd   : > { %1442 = shalt.err (!%p1439_p8)
}
 0x1be   : > { %s1511_s9 = smov 384   ;;  %s1512_s10 = smov 24  }
 0x1bf   : > { %1283 = dma.vmem_to_hbm [thread:$0]  (%p1629_p10), %s2022_s11, 12288, %s2020_s26, %s925_s7, %s1511_s9, %s1511_s9, %s1512_s10  }
 0x1c0 PF: > { %s956_s15 = sand.u32 1, %s1481_s12   ;;  %p2098_p12 = scmp.ne.s32.totalorder %s2088_s23, 0 }
 0x1c1   : > { %p2099_p11 = scmp.ge.s32.totalorder %s1501_s17, 2  ;;  %s957_s18 = scalar_lea.sflag [#allocation4], %s956_s15 }
 0x1c3   : > { %p1294_p0 = pnand %p2099_p11, %p2098_p12 }
 0x1c5   : > { %1476 = dma.done.wait (!%p1294_p0), %s957_s18, 12288  }
 0x1c6   : > { %1478 = vsyncadd (!%p1294_p0), %s957_s18, 4294955008  ;;  %s20_s17 = sadd.s32 1, %s1501_s17   ;;  %s2100_s12 = smov %s1485_s13 }
 0x1c7   : > { %p17_p5 = scmp.ge.s32.totalorder %s20_s17, 4   ;;  %s2101_s13 = smov %s1489_s14 }
 0x1c8   : > { %s2102_s14 = smov %s1638_s5  ;;  %s2103_s15 = smov %s1497_s16 }
 0x1c9   : > { %s2104_s16 = smov %s2106_s28  ;;  %19 = sbr.rel (!%p17_p5) target bundleno = 7 (0x7), region = 85 }
 0x1d0   :  { %962 = vsyncpa [#allocation3], 1 }
 0x1d1   :  { %964 = vsyncpa [#allocation3 + $0x1], 1 }
 0x1d2   :  { %965 = vsyncpa [#allocation6], 1 }
 0x1d3   :  { %966 = vsyncpa [#allocation4], 1 }
 0x1d4   :  { %968 = vsyncpa [#allocation4 + $0x1], 1 }

</bundles_post_ra>
